<compile_context>
chip_gen: v7x
topology: tpu7x:2x2x1
jax: 0.10.0
libtpu: 0.0.40
codegen_flags: <defaults>
</compile_context>

<pallas_src>
import functools

import jax
import jax.numpy as jnp
from jax.experimental import pallas as pl
from jax.experimental.pallas import tpu as pltpu

TAU = 0.005

LANE = 128
SUBLANE = 8
# 2048 rows x 128 lanes x 4 B = 1 MiB per block.  3 live arrays (ema, model,
# out) double-buffered ~= 6 MiB -> fits scoped VMEM on v5e (16 MiB default),
# v6e (32 MiB) and v7x (32 MiB scoped of 64 MiB physical).  If this is ever
# raised past ~4 MiB blocks, add vmem_limit_bytes for v5e.
MAX_TILE_ROWS = 2048


def _ceil_div(a, b):
    return -(-a // b)


def _round_up(a, b):
    return _ceil_div(a, b) * b


def _layout_for(n):
    """Rows / tile_rows for an n-element f32 vector laid out as (rows, 128).

    rows is a multiple of tile_rows, tile_rows a multiple of 8 sublanes, and
    whenever possible the grid has >= 2 steps (so v7x can use both TCs).
    """
    rows = _round_up(_ceil_div(n, LANE), SUBLANE)
    tile = min(MAX_TILE_ROWS, rows)
    if rows > SUBLANE:
        tile = min(tile, _round_up(_ceil_div(rows, 2), SUBLANE))
    rows = _round_up(rows, tile)
    return rows, tile


# ----------------------------------------------------------------------------
# Pallas kernels
# ----------------------------------------------------------------------------
def _ema_update_kernel(ema_ref, model_ref, out_ref, *, tau):
    # out = (1 - tau) * ema + tau * model   (pure VPU elementwise, lane-dense)
    out_ref[...] = (1.0 - tau) * ema_ref[...] + tau * model_ref[...]


def _actor_mlp_kernel(x_ref, w1_ref, b1_ref, w2_ref, b2_ref, w3_ref, b3_ref,
                      out_ref, *, max_action):
    # Fully fused 3-layer MLP: matmuls on the MXU, bias/ReLU on the VPU,
    # tanh on the EUP.  Intermediate activations never leave VMEM.
    h = jnp.dot(x_ref[...], w1_ref[...], preferred_element_type=jnp.float32)
    h = jnp.maximum(h + b1_ref[...], 0.0)
    h = jnp.dot(h, w2_ref[...], preferred_element_type=jnp.float32)
    h = jnp.maximum(h + b2_ref[...], 0.0)
    a = jnp.dot(h, w3_ref[...], preferred_element_type=jnp.float32)
    out_ref[...] = (jnp.tanh(a + b3_ref[...]) * max_action).astype(out_ref.dtype)


# ----------------------------------------------------------------------------
# EMA update: single jitted path, donated persistent buffer, in-place lerp
# ----------------------------------------------------------------------------
@functools.partial(jax.jit, static_argnames=("tau", "tile_rows"),
                   donate_argnums=(0,))
def _ema_update_flat(ema2d, model_params, *, tau, tile_rows):
    rows = ema2d.shape[0]
    # Flatten the incoming model tree into the same lane-dense layout (the
    # only re-layout left per update; XLA fuses concat + pad under this jit).
    leaves = jax.tree_util.tree_leaves(model_params)
    m_flat = jnp.concatenate([l.astype(jnp.float32).reshape(-1) for l in leaves])
    n = m_flat.shape[0]
    m2d = jnp.zeros((rows * LANE,), jnp.float32).at[:n].set(m_flat)
    m2d = m2d.reshape(rows, LANE)

    return pl.pallas_call(
        functools.partial(_ema_update_kernel, tau=tau),
        out_shape=jax.ShapeDtypeStruct((rows, LANE), jnp.float32),
        grid=(rows // tile_rows,),
        in_specs=[
            pl.BlockSpec((tile_rows, LANE), lambda i: (i, 0)),
            pl.BlockSpec((tile_rows, LANE), lambda i: (i, 0)),
        ],
        out_specs=pl.BlockSpec((tile_rows, LANE), lambda i: (i, 0)),
        input_output_aliases={0: 0},  # ema2d (donated) is updated in place
        compiler_params=pltpu.CompilerParams(
            dimension_semantics=("parallel",)),
    )(ema2d, m2d)


# ----------------------------------------------------------------------------
# Fused actor forward (feature dims padded to 128 lanes, batch to sublanes)
# ----------------------------------------------------------------------------
@functools.partial(jax.jit, static_argnames=("max_action",))
def actor_forward(params, x, max_action=1.0):
    B, S = x.shape
    H = params["w1"].shape[1]
    A = params["w3"].shape[1]

    Sp = _round_up(S, LANE)
    Hp = _round_up(H, LANE)
    Ap = _round_up(A, LANE)
    if B <= 256:
        tile_b = _round_up(B, SUBLANE)
        Bp = tile_b
    else:
        tile_b = 256  # multiple of 128 -> fine on v5e/v6e/v7x MXU M tiles
        Bp = _round_up(B, tile_b)

    f32 = jnp.float32
    xp = jnp.pad(x.astype(f32), ((0, Bp - B), (0, Sp - S)))
    w1 = jnp.pad(params["w1"].astype(f32), ((0, Sp - S), (0, Hp - H)))
    b1 = jnp.pad(params["b1"].astype(f32).reshape(1, H), ((0, 0), (0, Hp - H)))
    w2 = jnp.pad(params["w2"].astype(f32), ((0, Hp - H), (0, Hp - H)))
    b2 = jnp.pad(params["b2"].astype(f32).reshape(1, H), ((0, 0), (0, Hp - H)))
    w3 = jnp.pad(params["w3"].astype(f32), ((0, Hp - H), (0, Ap - A)))
    b3 = jnp.pad(params["b3"].astype(f32).reshape(1, A), ((0, 0), (0, Ap - A)))

    out = pl.pallas_call(
        functools.partial(_actor_mlp_kernel, max_action=max_action),
        out_shape=jax.ShapeDtypeStruct((Bp, Ap), f32),
        grid=(Bp // tile_b,),
        in_specs=[
            pl.BlockSpec((tile_b, Sp), lambda i: (i, 0)),
            pl.BlockSpec((Sp, Hp), lambda i: (0, 0)),
            pl.BlockSpec((1, Hp), lambda i: (0, 0)),
            pl.BlockSpec((Hp, Hp), lambda i: (0, 0)),
            pl.BlockSpec((1, Hp), lambda i: (0, 0)),
            pl.BlockSpec((Hp, Ap), lambda i: (0, 0)),
            pl.BlockSpec((1, Ap), lambda i: (0, 0)),
        ],
        out_specs=pl.BlockSpec((tile_b, Ap), lambda i: (i, 0)),
        compiler_params=pltpu.CompilerParams(
            dimension_semantics=("parallel",)),
    )(xp, w1, b1, w2, b2, w3, b3)

    return out[:B, :A].astype(x.dtype)


# ----------------------------------------------------------------------------
# "Model" (TD3 Actor MLP) params and EMA container
# ----------------------------------------------------------------------------
def init_actor_params(key, state_dim, hidden_dim, action_dim):
    k1, k2, k3, k4, k5, k6 = jax.random.split(key, 6)
    s = 0.1
    return {
        "w1": s * jax.random.normal(k1, (state_dim, hidden_dim), jnp.float32),
        "b1": s * jax.random.normal(k2, (hidden_dim,), jnp.float32),
        "w2": s * jax.random.normal(k3, (hidden_dim, hidden_dim), jnp.float32),
        "b2": s * jax.random.normal(k4, (hidden_dim,), jnp.float32),
        "w3": s * jax.random.normal(k5, (hidden_dim, action_dim), jnp.float32),
        "b3": s * jax.random.normal(k6, (action_dim,), jnp.float32),
    }


class EMA:
    """JAX/Pallas port of the PyTorch EMA module.

    EMA parameters live permanently in a lane-dense padded (rows, 128) f32
    buffer; update() is one jitted, donated, in-place Pallas lerp over it.
    """

    def __init__(self, model_params, tau=TAU):
        self.tau = float(tau)
        # deepcopy of the wrapped model's parameters, re-laid out once.
        # TODO(synk): model.eval()/requires_grad=False have no equivalent for
        # plain JAX arrays (no autograd state to freeze).
        leaves, treedef = jax.tree_util.tree_flatten(model_params)
        self._treedef = treedef
        self._shapes = tuple(l.shape for l in leaves)
        self._sizes = tuple(int(l.size) for l in leaves)
        self._n = sum(self._sizes)
        rows, tile = _layout_for(self._n)
        self._tile_rows = tile
        flat = jnp.concatenate(
            [jnp.asarray(l, jnp.float32).reshape(-1) for l in leaves])
        self.ema_flat = (jnp.zeros((rows * LANE,), jnp.float32)
                         .at[:self._n].set(flat).reshape(rows, LANE))
        self._cached_tree = None

    def update(self, model_params):
        # Persistent buffer is donated and aliased -> true in-place lerp.
        self.ema_flat = _ema_update_flat(
            self.ema_flat, model_params, tau=self.tau,
            tile_rows=self._tile_rows)
        self._cached_tree = None

    @property
    def ema_params(self):
        # Unflatten lazily (only when the forward / user actually needs a
        # parameter tree); params are tiny relative to the update traffic.
        if self._cached_tree is None:
            flat = self.ema_flat.reshape(-1)[:self._n]
            leaves, off = [], 0
            for shp, sz in zip(self._shapes, self._sizes):
                leaves.append(flat[off:off + sz].reshape(shp))
                off += sz
            self._cached_tree = jax.tree_util.tree_unflatten(
                self._treedef, leaves)
        return self._cached_tree

    def forward(self, x, max_action=1.0):
        return actor_forward(self.ema_params, x, max_action=max_action)

    __call__ = forward


# ----------------------------------------------------------------------------
# Main
# ----------------------------------------------------------------------------
if __name__ == "__main__":
    key = jax.random.PRNGKey(0)
    k_model, k_new, k_x = jax.random.split(key, 3)

    STATE_DIM, HIDDEN, ACTION_DIM, BATCH = 16, 32, 4, 2

    model_params = init_actor_params(k_model, STATE_DIM, HIDDEN, ACTION_DIM)
    ema = EMA(model_params, tau=TAU)

    # Simulate a training step producing new model params.
    leaves, treedef = jax.tree_util.tree_flatten(model_params)
    keys = jax.random.split(k_new, len(leaves))
    new_leaves = [p + 0.01 * jax.random.normal(k, p.shape, p.dtype)
                  for p, k in zip(leaves, keys)]
    new_model_params = jax.tree_util.tree_unflatten(treedef, new_leaves)

    # Two EMA updates so the check is non-trivial (ema != target).
    ema.update(new_model_params)
    ema.update(model_params)

    # Pure-JAX reference of the same two updates.
    ref_params = jax.tree_util.tree_map(lambda p: p, model_params)
    for target in (new_model_params, model_params):
        ref_params = jax.tree_util.tree_map(
            lambda e, m: (1.0 - TAU) * e + TAU * m, ref_params, target)
    for got, ref in zip(jax.tree_util.tree_leaves(ema.ema_params),
                        jax.tree_util.tree_leaves(ref_params)):
        assert got.shape == ref.shape
        assert jnp.allclose(got, ref, atol=1e-6), "EMA update mismatch"

    # Forward pass through the EMA model (single fused Pallas kernel).
    x = jax.random.normal(k_x, (BATCH, STATE_DIM), jnp.float32)
    out = jax.block_until_ready(ema(x))

    # Reference check of the forward pass (pure JAX).
    def ref_forward(p, xx):
        h = jnp.maximum(xx @ p["w1"] + p["b1"], 0.0)
        h = jnp.maximum(h @ p["w2"] + p["b2"], 0.0)
        return jnp.tanh(h @ p["w3"] + p["b3"])

    ref_out = ref_forward(ema.ema_params, x)
    assert out.shape == (BATCH, ACTION_DIM)
    assert jnp.allclose(out, ref_out, atol=1e-4), "forward mismatch"

    print("KERNEL_OK")
</pallas_src>

<mosaic_0001>
module attributes {stable_mosaic.version = 11 : i64} {
  func.func @_ema_update_kernel(%arg0: i32, %arg1: memref<8x128xf32, #tpu.memory_space<vmem>>, %arg2: memref<8x128xf32, #tpu.memory_space<vmem>>, %arg3: memref<8x128xf32, #tpu.memory_space<vmem>>) attributes {dimension_semantics = [#tpu.dimension_semantics<parallel>], iteration_bounds = array<i64: 2>, scalar_prefetch = 0 : i64, scratch_operands = 0 : i64, tpu.core_type = #tpu.core_type<tc>, window_params = [{transform_indices = @transform_0, window_bounds = array<i64: 8, 128>}, {transform_indices = @transform_1, window_bounds = array<i64: 8, 128>}, {transform_indices = @transform_2, window_bounds = array<i64: 8, 128>}]} {
    %c0 = arith.constant 0 : index
    %c0_0 = arith.constant 0 : index
    %0 = vector.load %arg1[%c0, %c0_0] : memref<8x128xf32, #tpu.memory_space<vmem>>, vector<8x128xf32>
    %cst = arith.constant 9.950000e-01 : f32
    %1 = vector.broadcast %cst : f32 to vector<8x128xf32>
    %2 = arith.mulf %1, %0 : vector<8x128xf32>
    %c0_1 = arith.constant 0 : index
    %c0_2 = arith.constant 0 : index
    %3 = vector.load %arg2[%c0_1, %c0_2] : memref<8x128xf32, #tpu.memory_space<vmem>>, vector<8x128xf32>
    %cst_3 = arith.constant 5.000000e-03 : f32
    %4 = vector.broadcast %cst_3 : f32 to vector<8x128xf32>
    %5 = arith.mulf %4, %3 : vector<8x128xf32>
    %6 = arith.addf %2, %5 : vector<8x128xf32>
    %c0_4 = arith.constant 0 : index
    %c0_5 = arith.constant 0 : index
    %7 = vector.load %arg3[%c0_4, %c0_5] : memref<8x128xf32, #tpu.memory_space<vmem>>, vector<8x128xf32>
    tpu.vector_store %arg3[%c0_4, %c0_5], %6 {strides = array<i32>} : memref<8x128xf32, #tpu.memory_space<vmem>>, vector<8x128xf32>,
    return
  }
  func.func @transform_0(%arg0: i32) -> (i32, i32) {
    %c0_i32 = arith.constant 0 : i32
    %c0_i32_0 = arith.constant 0 : i32
    return %arg0, %c0_i32 : i32, i32
  }
  func.func @transform_1(%arg0: i32) -> (i32, i32) {
    %c0_i32 = arith.constant 0 : i32
    %c0_i32_0 = arith.constant 0 : i32
    return %arg0, %c0_i32 : i32, i32
  }
  func.func @transform_2(%arg0: i32) -> (i32, i32) {
    %c0_i32 = arith.constant 0 : i32
    %c0_i32_0 = arith.constant 0 : i32
    return %arg0, %c0_i32 : i32, i32
  }
}

</mosaic_0001>

<bundles_post_ra>
// kernel: _ema_update_flat.1
= control target key start
LH: loop header
LB: loop body
LE: loop exit
PB: predicated region body
PF: predicated region fallthrough
CT: control target
= control target key end

     0   :  { %7 = vsyncpa [#allocation3], 0  ;;  %s618_s0 = inlined_call_operand.hbm [shape: f32[16,128], index: 0, kind: input, shape index: {}, may-alias: {0,2}]   ;;  %s619_s1 = inlined_call_operand.vmem [shape: f32[16,128], index: 1, kind: input, shape index: {}]   ;;  %s620_s2 = inlined_call_operand.hbm [shape: f32[16,128], index: 2, kind: output, shape index: {}, may-alias: {0,2}]  }
   0x1   :  { %9 = vsyncpa [#allocation3 + $0x1], 0 }
   0x2   :  { %10 = vsyncpa [#allocation4], 0 }
   0x3   :  { %12 = vsyncpa [#allocation4 + $0x1], 0  ;;  %s452_s9 = smov 0   ;;  %s454_s10 = smov 0  }
   0x4   :  { %s456_s11 = smov 0   ;;  %s458_s12 = smov 0  }
   0x5 LB: > { %s473_s13 = sadd.s32 4294967295, %s433_s12   ;;  %s278_s14 = sadd.s32 4294967294, %s433_s12   ;;  %s433_s12 = sphi %s458_s12, %s635_s12   ;;  %s429_s11 = sphi %s456_s11, %s634_s11   ;;  %s425_s10 = sphi %s454_s10, %s633_s10   ;;  %s421_s9 = sphi %s452_s9, %s632_s9  }
   0x6   : > { %s477_s15 = sadd.s32 1, %s433_s12   ;;  %s25_s16 = sadd.s32 1, %s429_s11 }
   0x7   : > { %s22_s17 = ssub.s32 %s433_s12, %s477_s15  ;;  %p32_p0 = scmp.ne.s32.totalorder %s429_s11, %s425_s10 }
   0x8   : > { %p23_p1 = scmp.eq.s32.totalorder %s22_s17, 0  ;;  %p33_p2 = scmp.eq.s32.totalorder %s433_s12, 0 }
   0x9   : > { %p38_p3 = scmp.ne.s32.totalorder %s425_s10, %s421_s9  ;;  %p39_p4 = scmp.eq.s32.totalorder %s473_s13, 0 }
   0xa   : > { %s489_s18 = scalar_select %p23_p1, %s429_s11, %s25_s16  }
   0xb   : > { %p491_p5 = por %p33_p2, %p32_p0  ;;  %p495_p6 = por %p39_p4, %p38_p3 }
   0xc   : > { %p88_p7 = scmp.eq.s32.totalorder %s473_s13, 1  ;;  %p94_p8 = scmp.eq.s32.totalorder %s278_s14, 1 }
   0xd   : > { %p303_p10 = scmp.lt.s32.totalorder %s433_s12, 2  ;;  %s114_s23 = sand.u32 1, %s429_s11  }
   0xe   : > { %p502_p11 = por %p88_p7, %p32_p0  ;;  %p506_p12 = por %p94_p8, %p38_p3 }
   0xf   : > { %s282_s24 = sshll.u32 %s433_s12, 7  ;;  %s281_s25 = sshll.u32 %s114_s23, 3 }
  0x10   : > { %s624_s21 = scalar_select %p502_p11, 1, 0 }
  0x11   : > { %s625_s22 = scalar_select %p506_p12, 1, 0 }
  0x12   : > { %s515_s28 = scalar_lea.hbm %s618_s0, %s282_s24  ;;  %s118_s29 = scalar_lea.vmem [#allocation2], %s281_s25 }
  0x13   : > { %s125_s30 = sshll.u32 %s118_s29, 4  ;;  %p519_p13 = pnand %p303_p10, %p491_p5  ;;  %s523_s30 = int_to_ptr.vmem [resolvable:$true] %s125_s30 }
  0x14   : > { %s115_s4 = scalar_lea.sflag [#allocation3], %s114_s23  ;;  %s337_s5 = scalar_lea.hbm %s515_s28, 128 }
  0x15   : > { %p338_p2 = scmp.ne.s32.totalorder %s515_s28, %s337_s5  ;;  %p339_p3 = pneg %p519_p13 }
  0x16   : > { %s342_s8 = scalar_lea.hbm %s618_s0, 256  ;;  %p343_p5 = scmp.lt.u32.totalorder %s515_s28, %s618_s0 }
  0x17   : > { %p340_p4 = pnand %p339_p3, %p338_p2  ;;  %p344_p8 = scmp.lt.u32.totalorder %s342_s8, %s337_s5 }
  0x18   : > { %p346_p9 = scmp.lt.u32.totalorder %s337_s5, %s515_s28 }
  0x19   : > { %p341_p7 = pneg %p340_p4  ;;  %p345_p10 = por %p344_p8, %p343_p5 }
  0x1b   : > { %p347_p0 = por %p346_p9, %p345_p10 }
  0x1d   : > { %p348_p1 = pnand %p347_p0, %p341_p7 }
  0x1f   : > { %351 = shalt.err (!%p348_p1)
}
  0x20   : > { %s352_s17 = scalar_lea.vmem %s523_s30, 128  ;;  %s435_s19 = smov [#allocation2]  }
  0x21   : > { %p353_p2 = scmp.ne.s32.totalorder %s523_s30, %s352_s17  ;;  %s357_s23 = sshll.u32 %s435_s19, 4  ;;  %s358_s23 = int_to_ptr.vmem [resolvable:$false] %s357_s23 }
  0x22   : > { %s359_s24 = scalar_lea.vmem %s358_s23, 256  ;;  %p360_p11 = scmp.lt.s32.totalorder %s523_s30, %s358_s23 }
  0x23   : > { %p355_p4 = pnand %p353_p2, %p339_p3  ;;  %p361_p5 = scmp.lt.s32.totalorder %s359_s24, %s352_s17 }
  0x25   : > { %p356_p12 = pneg %p355_p4  ;;  %p362_p8 = por %p361_p5, %p360_p11 }
  0x27   : > { %p363_p9 = pnand %p362_p8, %p356_p12 }
  0x29   : > { %366 = shalt.err (!%p363_p9)
}
  0x2a   : > { %298 = dma.hbm_to_vmem [thread:$0]  (!%p519_p13), %s515_s28, 128, %s523_s30, %s115_s4  }
  0x2b   : > { %p627_p0 = scmp.lt.s32.totalorder %s433_s12, 3  ;;  %p628_p1 = scmp.ge.s32.totalorder %s433_s12, 1 }
  0x2d   : > { %p138_p3 = pnand %p628_p1, %p627_p0 }
  0x2e   : > { %s557_s25 = sand.u32 (!%p138_p3), 1, %s425_s10  }
  0x2f   : > { %141 = sbr.rel (%p138_p3) target bundleno = 83 (0x53), region = 28  ;;  %s284_s26 = sshll.u32 (!%p138_p3), %s557_s25, 3 }
  0x30   : > { %s144_s27 = scalar_lea.sflag (!%p138_p3), [#allocation3], %s557_s25  ;;  %s147_s29 = scalar_lea.vmem (!%p138_p3), [#allocation2], %s284_s26 }
  0x36   : > { %412 = dma.done.wait (%p495_p6), %s144_s27, 128  }
  0x37   : > { %414 = vsyncadd (%p495_p6), %s144_s27, 4294967168  ;;  %p172_p11 = scmp.lt.s32.totalorder %s473_s13, 1  ;;  %v176_v0 = vld [vmem:[%s147_s29] sm:$0xff]  ;;  %s171_s6 = scalar_lea.vmem [#allocation5], %s284_s26 }
  0x38   : > { %s196_s7 = sshll.u32 %s171_s6, 4  ;;  %s288_s8 = sshll.u32 %s473_s13, 7  ;;  %v177_v2 = vmul.f32 0.995, %v176_v0  ;;  %s571_s7 = int_to_ptr.vmem [resolvable:$true] %s196_s7 }
  0x39   : > { %s173_s28 = scalar_select %p172_p11, %s473_s13, 1 }
  0x3a   : > { %s576_s16 = scalar_lea.hbm %s620_s2, %s288_s8  ;;  %s183_s17 = scalar_lea.sflag [#allocation4], %s557_s25 }
  0x3b   : > { %s286_s30 = sshll.u32 %s173_s28, 3  ;;  %s367_s19 = scalar_lea.vmem %s571_s7, 128 }
  0x3c   : > { %s175_s5 = scalar_lea.vmem %s619_s1, %s286_s30  ;;  %p368_p6 = scmp.ne.s32.totalorder %s571_s7, %s367_s19 }
  0x3d   : > { %v178_v1 = vld [vmem:[%s175_s5] sm:$0xff]  ;;  %p629_p12 = scmp.ne.s32.totalorder %s624_s21, 0  ;;  %s436_s13 = smov [#allocation5]  }
  0x3e   : > { %v179_v3 = vmul.f32 0.005, %v178_v1  ;;  %s371_s23 = sshll.u32 %s436_s13, 4  ;;  %s372_s23 = int_to_ptr.vmem [resolvable:$false] %s371_s23 }
  0x3f   : > { %p369_p13 = pnand %p368_p6, %p629_p12  ;;  %s373_s24 = scalar_lea.vmem %s372_s23, 256 }
  0x40   : > { %v180_v4 = vadd.f32 %v179_v3, %v177_v2  ;;  %p374_p10 = scmp.lt.s32.totalorder %s571_s7, %s372_s23  ;;  %p375_p2 = scmp.lt.s32.totalorder %s373_s24, %s367_s19 }
  0x41   : > { %p370_p7 = pneg %p369_p13 }
  0x42   : > { %181 = vst [vmem:[%s171_s6] sm:$0xff] %v180_v4  ;;  %p376_p4 = por %p375_p2, %p374_p10 }
  0x44   : > { %p377_p5 = pnand %p376_p4, %p370_p7 }
  0x46   : > { %380 = shalt.err (!%p377_p5)
}
  0x47   : > { %s381_s25 = scalar_lea.hbm %s576_s16, 128  ;;  %s385_s29 = scalar_lea.hbm %s620_s2, 256 }
  0x48   : > { %p382_p8 = scmp.ne.s32.totalorder %s576_s16, %s381_s25  ;;  %p386_p1 = scmp.lt.u32.totalorder %s576_s16, %s620_s2 }
  0x49   : > { %p387_p3 = scmp.lt.u32.totalorder %s385_s29, %s381_s25  ;;  %p389_p6 = scmp.lt.u32.totalorder %s381_s25, %s576_s16 }
  0x4a   : > { %p383_p9 = pnand %p382_p8, %p629_p12 }
  0x4b   : > { %p388_p11 = por %p387_p3, %p386_p1 }
  0x4c   : > { %p384_p0 = pneg %p383_p9 }
  0x4d   : > { %p390_p13 = por %p389_p6, %p388_p11 }
  0x4f   : > { %p391_p7 = pnand %p390_p13, %p384_p0 }
  0x51   : > { %394 = shalt.err (!%p391_p7)
}
  0x52   : > { %293 = dma.vmem_to_hbm [thread:$0]  (%p629_p12), %s571_s7, 128, %s576_s16, %s183_s17  }
  0x53 PF: > { %s208_s3 = sand.u32 1, %s421_s9   ;;  %p630_p10 = scmp.ne.s32.totalorder %s625_s22, 0 }
  0x54   : > { %p631_p2 = scmp.ge.s32.totalorder %s433_s12, 2  ;;  %s209_s4 = scalar_lea.sflag [#allocation4], %s208_s3 }
  0x56   : > { %p300_p4 = pnand %p631_p2, %p630_p10 }
  0x58   : > { %416 = dma.done.wait (!%p300_p4), %s209_s4, 128  }
  0x59   : > { %418 = vsyncadd (!%p300_p4), %s209_s4, 4294967168  ;;  %p15_p5 = scmp.ge.s32.totalorder %s477_s15, 4   ;;  %s632_s9 = smov %s425_s10 }
  0x5a   : > { %s633_s10 = smov %s429_s11  ;;  %s634_s11 = smov %s489_s18 }
  0x5b   : > { %s635_s12 = smov %s477_s15  ;;  %17 = sbr.rel (!%p15_p5) target bundleno = 5 (0x5), region = 76 }
  0x62   :  { %214 = vsyncpa [#allocation3], 1 }
  0x63   :  { %216 = vsyncpa [#allocation3 + $0x1], 1 }
  0x64   :  { %217 = vsyncpa [#allocation4], 1 }
  0x65   :  { %219 = vsyncpa [#allocation4 + $0x1], 1 }

</bundles_post_ra>
